<compile_context>
chip_gen: v5e
topology: v5e:2x2
jax: 0.10.0
libtpu: 0.0.40
codegen_flags: <defaults>
</compile_context>

<pallas_src>
import jax
import jax.numpy as jnp
from jax import lax
from jax.experimental import pallas as pl
from jax.experimental.pallas import tpu as pltpu


def _mkconv_kernel(x_ref, w_ref, b_ref, o_ref, rhs_ref):
    # x_ref:   (B_TILE, C_in, L)   activations, NCL layout (length on lanes)
    # w_ref:   (C_out, 5*C_in)     tap-flattened weights (unused taps are zero)
    # b_ref:   (C_out, 1)          concatenated biases [b3; b4; b5]
    # o_ref:   (B_TILE, C_out, L)
    # rhs_ref: (5*C_in, L)         VMEM scratch: im2col stack; row block j holds
    #                              x shifted by (j - 2) along L (zeros outside [0, L)).
    B_TILE, C_in, L = x_ref.shape

    w = w_ref[...]                          # hoisted: loaded once per grid step
    bias = b_ref[...]                       # (C_out, 1) -> lane-broadcast in epilogue

    # Constant zero-halo columns of the im2col stack.  Written unconditionally each
    # grid step (tiny) so correctness never depends on grid semantics / core id.
    z2 = jnp.zeros((C_in, 2), dtype=x_ref.dtype)
    rhs_ref[0 * C_in:1 * C_in, 0:2] = z2              # tap 0 (x[l-2]): cols 0,1
    rhs_ref[1 * C_in:2 * C_in, 0:1] = z2[:, :1]       # tap 1 (x[l-1]): col 0
    rhs_ref[3 * C_in:4 * C_in, L - 1:L] = z2[:, :1]   # tap 3 (x[l+1]): col L-1
    rhs_ref[4 * C_in:5 * C_in, L - 2:L] = z2          # tap 4 (x[l+2]): cols L-2,L-1

    for b in range(B_TILE):                 # short static unroll over batch rows
        xv = x_ref[b]                       # (C_in, L)
        # im2col: rhs[j*C_in + c, l] = x[c, l + j - 2], zero outside the valid range.
        for j in range(5):
            lo = max(0, 2 - j)              # first valid output column for this tap
            hi = L - max(0, j - 2)          # one past last valid output column
            rhs_ref[j * C_in:(j + 1) * C_in, lo:hi] = xv[:, lo + j - 2:hi + j - 2]
        # Single fused MXU contraction over (tap, in-channel).
        acc = jnp.dot(w, rhs_ref[...], preferred_element_type=jnp.float32)  # (C_out, L)
        # Per-branch ReLU + channel concat == ReLU on the fused result; bias in epilogue.
        o_ref[b] = jnp.maximum(acc + bias, 0.0).astype(o_ref.dtype)


def _pick_batch_tile(N, C_in, C_out, L, itemsize=4, max_tile=8, per_block_cap=4 << 20):
    """Largest divisor of N (capped) such that the in+out blocks stay small in VMEM."""
    bytes_per_row = (C_in + C_out) * L * itemsize
    cap = max(1, min(max_tile, per_block_cap // max(bytes_per_row, 1)))
    t = max(1, min(N, cap))
    while N % t:
        t -= 1
    return t


@jax.jit
def multi_kernel_conv(x_ncl, w3, w4, w5, b3, b4, b5):
    """x_ncl: (N, C_in, L) float32.  w{K}: (C_out_g, C_in, K) PyTorch Conv1d layout.
    Returns (N, 3*C_out_g, L) in the PyTorch NCL convention."""
    N, C_in, L = x_ncl.shape
    Cg = w3.shape[0]
    C_out = 3 * Cg
    assert L >= 4, "sequence length must be >= 4"

    # Combined tap-major weights (5, C_out, C_in).  With x zero-padded by 2 on both
    # length ends (x_pad[:, p] = x[:, p-2]):
    #   conv3 (K=3, pad=1):                out3[l] = sum_k w3[k] . x_pad[l+1+k]  -> taps 1..3
    #   conv4 (K=4, pad=2, drop last col): out4[l] = sum_k w4[k] . x_pad[l+k]    -> taps 0..3
    #   conv5 (K=5, pad=2):                out5[l] = sum_k w5[k] . x_pad[l+k]    -> taps 0..4
    w_comb = jnp.zeros((5, C_out, C_in), dtype=x_ncl.dtype)
    w_comb = w_comb.at[1:4, 0:Cg, :].set(jnp.transpose(w3, (2, 0, 1)))
    w_comb = w_comb.at[0:4, Cg:2 * Cg, :].set(jnp.transpose(w4, (2, 0, 1)))
    w_comb = w_comb.at[0:5, 2 * Cg:3 * Cg, :].set(jnp.transpose(w5, (2, 0, 1)))
    # Flatten the tap axis into the contraction: (C_out, 5*C_in),
    # column block j holds tap j (matches the im2col row blocks in the kernel).
    w_flat = jnp.transpose(w_comb, (1, 0, 2)).reshape(C_out, 5 * C_in)
    b_comb = jnp.concatenate([b3, b4, b5]).reshape(C_out, 1).astype(jnp.float32)

    B_TILE = _pick_batch_tile(N, C_in, C_out, L)
    grid = (N // B_TILE,)

    out = pl.pallas_call(
        _mkconv_kernel,
        out_shape=jax.ShapeDtypeStruct((N, C_out, L), x_ncl.dtype),
        grid_spec=pltpu.PrefetchScalarGridSpec(
            num_scalar_prefetch=0,
            grid=grid,
            in_specs=[
                pl.BlockSpec((B_TILE, C_in, L), lambda n: (n, 0, 0)),      # activations
                pl.BlockSpec((C_out, 5 * C_in), lambda n: (0, 0)),          # fused weights
                pl.BlockSpec((C_out, 1), lambda n: (0, 0)),                 # fused bias
            ],
            out_specs=pl.BlockSpec((B_TILE, C_out, L), lambda n: (n, 0, 0)),
            scratch_shapes=[pltpu.VMEM((5 * C_in, L), x_ncl.dtype)],        # im2col stack
        ),
        compiler_params=pltpu.CompilerParams(
            dimension_semantics=("parallel",),          # megacore sharding over batch tiles
            vmem_limit_bytes=32 * 1024 * 1024,          # safe across v5e/v6e/v7x
        ),
    )(x_ncl, w_flat, b_comb)
    return out


def _reference(x_ncl, w3, w4, w5, b3, b4, b5):
    """Pure-JAX reference using lax.conv_general_dilated (NCH layout, like PyTorch)."""
    dn = ("NCH", "OIH", "NCH")

    def conv(x, w, b, pad):
        y = lax.conv_general_dilated(x, w, window_strides=(1,),
                                     padding=[(pad, pad)], dimension_numbers=dn)
        return y + b[None, :, None]

    f1 = jax.nn.relu(conv(x_ncl, w3, b3, 1))
    f2 = jax.nn.relu(conv(x_ncl, w4, b4, 2)[:, :, :-1])
    f3 = jax.nn.relu(conv(x_ncl, w5, b5, 2))
    return jnp.concatenate([f1, f2, f3], axis=1)


if __name__ == "__main__":
    # Small shapes consistent with the module: in_channels=4, out_channels=6 (=> 2 per branch).
    N, C_in, L = 2, 4, 16
    out_channels = 6
    Cg = out_channels // 3

    key = jax.random.PRNGKey(0)
    kx, k3, k4, k5, kb3, kb4, kb5 = jax.random.split(key, 7)

    x = jax.random.normal(kx, (N, C_in, L), dtype=jnp.float32)
    # PyTorch Conv1d weight layout: (out, in, kernel).
    w3 = jax.random.normal(k3, (Cg, C_in, 3), dtype=jnp.float32) * 0.1
    w4 = jax.random.normal(k4, (Cg, C_in, 4), dtype=jnp.float32) * 0.1
    w5 = jax.random.normal(k5, (Cg, C_in, 5), dtype=jnp.float32) * 0.1
    b3 = jax.random.normal(kb3, (Cg,), dtype=jnp.float32) * 0.1
    b4 = jax.random.normal(kb4, (Cg,), dtype=jnp.float32) * 0.1
    b5 = jax.random.normal(kb5, (Cg,), dtype=jnp.float32) * 0.1

    out = multi_kernel_conv(x, w3, w4, w5, b3, b4, b5)
    out = jax.block_until_ready(out)

    ref = _reference(x, w3, w4, w5, b3, b4, b5)
    assert out.shape == (N, out_channels, L), out.shape
    assert jnp.allclose(out, ref, atol=1e-4, rtol=1e-4), "mismatch vs lax conv reference"

    print("KERNEL_OK")
</pallas_src>

<mosaic_0001>
module attributes {stable_mosaic.version = 11 : i64} {
  func.func @_mkconv_kernel(%arg0: i32, %arg1: memref<2x4x16xf32, #tpu.memory_space<vmem>>, %arg2: memref<6x20xf32, #tpu.memory_space<vmem>>, %arg3: memref<6x1xf32, #tpu.memory_space<vmem>>, %arg4: memref<2x6x16xf32, #tpu.memory_space<vmem>>, %arg5: memref<20x16xf32, #tpu.memory_space<vmem>>) attributes {dimension_semantics = [#tpu.dimension_semantics<parallel>], iteration_bounds = array<i64: 1>, scalar_prefetch = 0 : i64, scratch_operands = 1 : i64, tpu.core_type = #tpu.core_type<tc>, window_params = [{transform_indices = @transform_0, window_bounds = array<i64: 2, 4, 16>}, {pipeline_mode = #tpu.pipeline_mode<synchronous>, transform_indices = @transform_1, window_bounds = array<i64: 6, 20>}, {pipeline_mode = #tpu.pipeline_mode<synchronous>, transform_indices = @transform_2, window_bounds = array<i64: 6, 1>}, {transform_indices = @transform_3, window_bounds = array<i64: 2, 6, 16>}]} {
    %c0 = arith.constant 0 : index
    %c0_0 = arith.constant 0 : index
    %0 = vector.load %arg2[%c0, %c0_0] : memref<6x20xf32, #tpu.memory_space<vmem>>, vector<6x20xf32>
    %c0_1 = arith.constant 0 : index
    %c0_2 = arith.constant 0 : index
    %1 = vector.load %arg3[%c0_1, %c0_2] : memref<6x1xf32, #tpu.memory_space<vmem>>, vector<6x1xf32>
    %cst = arith.constant 0.000000e+00 : f32
    %2 = vector.broadcast %cst : f32 to vector<4x2xf32>
    %c0_3 = arith.constant 0 : index
    %c0_4 = arith.constant 0 : index
    %3 = vector.load %arg5[%c0_3, %c0_4] : memref<20x16xf32, #tpu.memory_space<vmem>>, vector<4x2xf32>
    tpu.vector_store %arg5[%c0_3, %c0_4], %2 {strides = array<i32>} : memref<20x16xf32, #tpu.memory_space<vmem>>, vector<4x2xf32>,
    %4 = vector.extract_strided_slice %2 {offsets = [0, 0], sizes = [4, 1], strides = [1, 1]} : vector<4x2xf32> to vector<4x1xf32>
    %c4 = arith.constant 4 : index
    %c0_5 = arith.constant 0 : index
    %5 = vector.load %arg5[%c4, %c0_5] : memref<20x16xf32, #tpu.memory_space<vmem>>, vector<4x1xf32>
    tpu.vector_store %arg5[%c4, %c0_5], %4 {strides = array<i32>} : memref<20x16xf32, #tpu.memory_space<vmem>>, vector<4x1xf32>,
    %6 = vector.extract_strided_slice %2 {offsets = [0, 0], sizes = [4, 1], strides = [1, 1]} : vector<4x2xf32> to vector<4x1xf32>
    %c12 = arith.constant 12 : index
    %c15 = arith.constant 15 : index
    %7 = vector.load %arg5[%c12, %c15] : memref<20x16xf32, #tpu.memory_space<vmem>>, vector<4x1xf32>
    tpu.vector_store %arg5[%c12, %c15], %6 {strides = array<i32>} : memref<20x16xf32, #tpu.memory_space<vmem>>, vector<4x1xf32>,
    %c16 = arith.constant 16 : index
    %c14 = arith.constant 14 : index
    %8 = vector.load %arg5[%c16, %c14] : memref<20x16xf32, #tpu.memory_space<vmem>>, vector<4x2xf32>
    tpu.vector_store %arg5[%c16, %c14], %2 {strides = array<i32>} : memref<20x16xf32, #tpu.memory_space<vmem>>, vector<4x2xf32>,
    %c0_6 = arith.constant 0 : index
    %c0_7 = arith.constant 0 : index
    %c0_8 = arith.constant 0 : index
    %9 = vector.load %arg1[%c0_6, %c0_7, %c0_8] : memref<2x4x16xf32, #tpu.memory_space<vmem>>, vector<1x4x16xf32>
    %10 = vector.shape_cast %9 : vector<1x4x16xf32> to vector<4x16xf32>
    %11 = vector.extract_strided_slice %10 {offsets = [0, 0], sizes = [4, 14], strides = [1, 1]} : vector<4x16xf32> to vector<4x14xf32>
    %c0_9 = arith.constant 0 : index
    %c2 = arith.constant 2 : index
    %12 = vector.load %arg5[%c0_9, %c2] : memref<20x16xf32, #tpu.memory_space<vmem>>, vector<4x14xf32>
    tpu.vector_store %arg5[%c0_9, %c2], %11 {strides = array<i32>} : memref<20x16xf32, #tpu.memory_space<vmem>>, vector<4x14xf32>,
    %13 = vector.extract_strided_slice %10 {offsets = [0, 0], sizes = [4, 15], strides = [1, 1]} : vector<4x16xf32> to vector<4x15xf32>
    %c4_10 = arith.constant 4 : index
    %c1 = arith.constant 1 : index
    %14 = vector.load %arg5[%c4_10, %c1] : memref<20x16xf32, #tpu.memory_space<vmem>>, vector<4x15xf32>
    tpu.vector_store %arg5[%c4_10, %c1], %13 {strides = array<i32>} : memref<20x16xf32, #tpu.memory_space<vmem>>, vector<4x15xf32>,
    %c8 = arith.constant 8 : index
    %c0_11 = arith.constant 0 : index
    %15 = vector.load %arg5[%c8, %c0_11] : memref<20x16xf32, #tpu.memory_space<vmem>>, vector<4x16xf32>
    tpu.vector_store %arg5[%c8, %c0_11], %10 {strides = array<i32>} : memref<20x16xf32, #tpu.memory_space<vmem>>, vector<4x16xf32>,
    %16 = vector.extract_strided_slice %10 {offsets = [0, 1], sizes = [4, 15], strides = [1, 1]} : vector<4x16xf32> to vector<4x15xf32>
    %c12_12 = arith.constant 12 : index
    %c0_13 = arith.constant 0 : index
    %17 = vector.load %arg5[%c12_12, %c0_13] : memref<20x16xf32, #tpu.memory_space<vmem>>, vector<4x15xf32>
    tpu.vector_store %arg5[%c12_12, %c0_13], %16 {strides = array<i32>} : memref<20x16xf32, #tpu.memory_space<vmem>>, vector<4x15xf32>,
    %18 = vector.extract_strided_slice %10 {offsets = [0, 2], sizes = [4, 14], strides = [1, 1]} : vector<4x16xf32> to vector<4x14xf32>
    %c16_14 = arith.constant 16 : index
    %c0_15 = arith.constant 0 : index
    %19 = vector.load %arg5[%c16_14, %c0_15] : memref<20x16xf32, #tpu.memory_space<vmem>>, vector<4x14xf32>
    tpu.vector_store %arg5[%c16_14, %c0_15], %18 {strides = array<i32>} : memref<20x16xf32, #tpu.memory_space<vmem>>, vector<4x14xf32>,
    %c0_16 = arith.constant 0 : index
    %c0_17 = arith.constant 0 : index
    %20 = vector.load %arg5[%c0_16, %c0_17] : memref<20x16xf32, #tpu.memory_space<vmem>>, vector<20x16xf32>
    %cst_18 = arith.constant dense<0.000000e+00> : vector<6x16xf32>
    %21 = tpu.matmul %0, %20, %cst_18 {dimension_numbers = #tpu.dot_dimension_numbers<[1], [0], [0], [1], [0, 0, 1, 1], [], []>} : vector<6x20xf32>, vector<20x16xf32>, vector<6x16xf32> -> vector<6x16xf32>
    %22 = vector.broadcast %1 : vector<6x1xf32> to vector<6x16xf32>
    %23 = arith.addf %21, %22 : vector<6x16xf32>
    %cst_19 = arith.constant 0.000000e+00 : f32
    %24 = vector.broadcast %cst_19 : f32 to vector<6x16xf32>
    %25 = arith.maximumf %23, %24 : vector<6x16xf32>
    %c0_20 = arith.constant 0 : index
    %c0_21 = arith.constant 0 : index
    %c0_22 = arith.constant 0 : index
    %26 = vector.load %arg4[%c0_20, %c0_21, %c0_22] : memref<2x6x16xf32, #tpu.memory_space<vmem>>, vector<1x6x16xf32>
    %27 = vector.shape_cast %26 : vector<1x6x16xf32> to vector<6x16xf32>
    %28 = vector.shape_cast %25 : vector<6x16xf32> to vector<1x6x16xf32>
    tpu.vector_store %arg4[%c0_20, %c0_21, %c0_22], %28 {strides = array<i32>} : memref<2x6x16xf32, #tpu.memory_space<vmem>>, vector<1x6x16xf32>,
    %c1_23 = arith.constant 1 : index
    %c0_24 = arith.constant 0 : index
    %c0_25 = arith.constant 0 : index
    %29 = vector.load %arg1[%c1_23, %c0_24, %c0_25] : memref<2x4x16xf32, #tpu.memory_space<vmem>>, vector<1x4x16xf32>
    %30 = vector.shape_cast %29 : vector<1x4x16xf32> to vector<4x16xf32>
    %31 = vector.extract_strided_slice %30 {offsets = [0, 0], sizes = [4, 14], strides = [1, 1]} : vector<4x16xf32> to vector<4x14xf32>
    %c0_26 = arith.constant 0 : index
    %c2_27 = arith.constant 2 : index
    %32 = vector.load %arg5[%c0_26, %c2_27] : memref<20x16xf32, #tpu.memory_space<vmem>>, vector<4x14xf32>
    tpu.vector_store %arg5[%c0_26, %c2_27], %31 {strides = array<i32>} : memref<20x16xf32, #tpu.memory_space<vmem>>, vector<4x14xf32>,
    %33 = vector.extract_strided_slice %30 {offsets = [0, 0], sizes = [4, 15], strides = [1, 1]} : vector<4x16xf32> to vector<4x15xf32>
    %c4_28 = arith.constant 4 : index
    %c1_29 = arith.constant 1 : index
    %34 = vector.load %arg5[%c4_28, %c1_29] : memref<20x16xf32, #tpu.memory_space<vmem>>, vector<4x15xf32>
    tpu.vector_store %arg5[%c4_28, %c1_29], %33 {strides = array<i32>} : memref<20x16xf32, #tpu.memory_space<vmem>>, vector<4x15xf32>,
    %c8_30 = arith.constant 8 : index
    %c0_31 = arith.constant 0 : index
    %35 = vector.load %arg5[%c8_30, %c0_31] : memref<20x16xf32, #tpu.memory_space<vmem>>, vector<4x16xf32>
    tpu.vector_store %arg5[%c8_30, %c0_31], %30 {strides = array<i32>} : memref<20x16xf32, #tpu.memory_space<vmem>>, vector<4x16xf32>,
    %36 = vector.extract_strided_slice %30 {offsets = [0, 1], sizes = [4, 15], strides = [1, 1]} : vector<4x16xf32> to vector<4x15xf32>
    %c12_32 = arith.constant 12 : index
    %c0_33 = arith.constant 0 : index
    %37 = vector.load %arg5[%c12_32, %c0_33] : memref<20x16xf32, #tpu.memory_space<vmem>>, vector<4x15xf32>
    tpu.vector_store %arg5[%c12_32, %c0_33], %36 {strides = array<i32>} : memref<20x16xf32, #tpu.memory_space<vmem>>, vector<4x15xf32>,
    %38 = vector.extract_strided_slice %30 {offsets = [0, 2], sizes = [4, 14], strides = [1, 1]} : vector<4x16xf32> to vector<4x14xf32>
    %c16_34 = arith.constant 16 : index
    %c0_35 = arith.constant 0 : index
    %39 = vector.load %arg5[%c16_34, %c0_35] : memref<20x16xf32, #tpu.memory_space<vmem>>, vector<4x14xf32>
    tpu.vector_store %arg5[%c16_34, %c0_35], %38 {strides = array<i32>} : memref<20x16xf32, #tpu.memory_space<vmem>>, vector<4x14xf32>,
    %c0_36 = arith.constant 0 : index
    %c0_37 = arith.constant 0 : index
    %40 = vector.load %arg5[%c0_36, %c0_37] : memref<20x16xf32, #tpu.memory_space<vmem>>, vector<20x16xf32>
    %cst_38 = arith.constant dense<0.000000e+00> : vector<6x16xf32>
    %41 = tpu.matmul %0, %40, %cst_38 {dimension_numbers = #tpu.dot_dimension_numbers<[1], [0], [0], [1], [0, 0, 1, 1], [], []>} : vector<6x20xf32>, vector<20x16xf32>, vector<6x16xf32> -> vector<6x16xf32>
    %42 = vector.broadcast %1 : vector<6x1xf32> to vector<6x16xf32>
    %43 = arith.addf %41, %42 : vector<6x16xf32>
    %cst_39 = arith.constant 0.000000e+00 : f32
    %44 = vector.broadcast %cst_39 : f32 to vector<6x16xf32>
    %45 = arith.maximumf %43, %44 : vector<6x16xf32>
    %c1_40 = arith.constant 1 : index
    %c0_41 = arith.constant 0 : index
    %c0_42 = arith.constant 0 : index
    %46 = vector.load %arg4[%c1_40, %c0_41, %c0_42] : memref<2x6x16xf32, #tpu.memory_space<vmem>>, vector<1x6x16xf32>
    %47 = vector.shape_cast %46 : vector<1x6x16xf32> to vector<6x16xf32>
    %48 = vector.shape_cast %45 : vector<6x16xf32> to vector<1x6x16xf32>
    tpu.vector_store %arg4[%c1_40, %c0_41, %c0_42], %48 {strides = array<i32>} : memref<2x6x16xf32, #tpu.memory_space<vmem>>, vector<1x6x16xf32>,
    return
  }
  func.func @transform_0(%arg0: i32) -> (i32, i32, i32) {
    %c0_i32 = arith.constant 0 : i32
    %c0_i32_0 = arith.constant 0 : i32
    %c0_i32_1 = arith.constant 0 : i32
    return %arg0, %c0_i32, %c0_i32_0 : i32, i32, i32
  }
  func.func @transform_1(%arg0: i32) -> (i32, i32) {
    %c0_i32 = arith.constant 0 : i32
    %c0_i32_0 = arith.constant 0 : i32
    %c0_i32_1 = arith.constant 0 : i32
    return %c0_i32, %c0_i32_0 : i32, i32
  }
  func.func @transform_2(%arg0: i32) -> (i32, i32) {
    %c0_i32 = arith.constant 0 : i32
    %c0_i32_0 = arith.constant 0 : i32
    %c0_i32_1 = arith.constant 0 : i32
    return %c0_i32, %c0_i32_0 : i32, i32
  }
  func.func @transform_3(%arg0: i32) -> (i32, i32, i32) {
    %c0_i32 = arith.constant 0 : i32
    %c0_i32_0 = arith.constant 0 : i32
    %c0_i32_1 = arith.constant 0 : i32
    return %arg0, %c0_i32, %c0_i32_0 : i32, i32, i32
  }
}

</mosaic_0001>

<bundles_post_ra>
// kernel: multi_kernel_conv.1
= control target key start
LH: loop header
LB: loop body
LE: loop exit
PB: predicated region body
PF: predicated region fallthrough
CT: control target
= control target key end

     0   :  { %vm16_vm0 = vcmask 11264   ;;  %s154_s14 = smov 2   ;;  %s155_s15 = smov 126   ;;  %v156_v2 = vmov 0.0   ;;  %vm22_vm1 = vcmask 126064   ;;  %vm18_vm2 = vcmask 3072   ;;  %s210_s0 = inlined_call_operand.vmem [shape: f32[2,4,16], index: 0, kind: input, shape index: {}]   ;;  %s211_s2 = inlined_call_operand.vmem [shape: f32[6,1], index: 2, kind: input, shape index: {}]   ;;  %s212_s1 = inlined_call_operand.vmem [shape: f32[6,20], index: 1, kind: input, shape index: {}]   ;;  %s213_s3 = inlined_call_operand.vmem [shape: f32[2,6,16], index: 3, kind: output, shape index: {}]  }
   0x1   :  { %v24_v0 = vld [vmem:[%s210_s0] sm:$0xf]  ;;  %v142_v1 = vld [vmem:[%s210_s0 + $0x4] sm:$0xf]  ;;  %17 = vst.msk [vmem:[#allocation2] sm:$0xf] %vm16_vm0, %v156_v2 }
   0x2   :  { %26 = vrot.lane.b32.xlu1 %v24_v0, %s154_s14  ;;  %43 = vrot.lane.b32.xlu0 %v24_v0, %s155_s15  ;;  %s157_s18 = smov 1   ;;  %s158_s19 = smov 127   ;;  %23 = vst.msk [vmem:[#allocation2 + $0x10] sm:$0xf] %vm22_vm1, %v156_v2  ;;  %vm20_vm3 = vcmask 126072   ;;  %vm36_vm4 = vcmask 125952  }
   0x3   :  { %103 = vrot.lane.b32.xlu2 %v142_v1, %s155_s15  ;;  %19 = vst.msk [vmem:[#allocation2 + $0x4] sm:$0xf] %vm18_vm2, %v156_v2  ;;  %vm29_vm5 = vcmask 125968   ;;  %v15_v3 = vld [vmem:[%s211_s2] sm:$0x3f]  ;;  %vm46_vm6 = vcmask 109568  }
   0x4   :  { %21 = vst.msk [vmem:[#allocation2 + $0xc] sm:$0xf] %vm20_vm3, %v156_v2  ;;  %v159_v4 = vmov 0   ;;  %vm34_vm7 = vcmask 125960   ;;  %vm41_vm8 = vcmask 117760   ;;  %vm60_vm9 = vcmask 1043456  }
   0x5   :  { %37 = vst.msk [vmem:[#allocation2 + $0x8] sm:$0xf] %vm36_vm4, %v24_v0  ;;  %152 = vset.pattern.permute.xlu2 %v159_v4  ;;  %153 = vset.pattern.permute.xlu0 %v159_v4  ;;  %v14_v16 = vld [vmem:[%s212_s1] sm:$0x3f]  ;;  %vm56_vm10 = vcmask 162816   ;;  %vm85_vm11 = vcmask 128000  }
   0xa   :  { %31 = vrot.lane.b32.xlu1 %v24_v0, %s157_s18  ;;  %38 = vrot.lane.b32.xlu0 %v24_v0, %s158_s19 }
   0xb   :  { %99 = vrot.lane.b32.xlu2 %v142_v1, %s158_s19 }
  0x12   :  { %94 = vrot.lane.b32.xlu1 %v142_v1, %s157_s18  ;;  %90 = vrot.lane.b32.xlu0 %v142_v1, %s154_s14 }
  0x13   :  { %53 = vperm.xlu2 %152, %v15_v3  }
  0x5d   :  { %v104_v7 = vpop.permute.xlu2 %103 }
  0x65   :  { %v100_v11 = vpop.permute.xlu2 %99 }
  0x6d   :  { %v54_v20 = vpop.permute.xlu2 %53 }
  0x74   :  { %v27_v5 = vpop.permute.xlu1 %26  ;;  %v44_v6 = vpop.permute.xlu0 %43 }
  0x75   :  { %30 = vst.msk [vmem:[#allocation2] sm:$0xf] %vm29_vm5, %v27_v5 }
  0x76   :  { %47 = vst.msk [vmem:[#allocation2 + $0x10] sm:$0xf] %vm46_vm6, %v44_v6 }
  0x7c   :  { %v32_v8 = vpop.permute.xlu1 %31  ;;  %v39_v9 = vpop.permute.xlu0 %38 }
  0x7d   :  { %35 = vst.msk [vmem:[#allocation2 + $0x4] sm:$0xf] %vm34_vm7, %v32_v8  ;;  %v50_v10 = vld [vmem:[#allocation2 + $0x10] sm:$0xf] }
  0x7e   :  { %42 = vst.msk [vmem:[#allocation2 + $0xc] sm:$0xf] %vm41_vm8, %v39_v9  ;;  %140 = vmatpush.msk.msra.mxu0 %vm60_vm9, %v50_v10 }
  0x7f   :  { %106 = vst.msk [vmem:[#allocation2 + $0x10] sm:$0xf] %vm46_vm6, %v104_v7 }
  0x84   :  { %v91_v12 = vpop.permute.xlu0 %90  ;;  %v48_v13 = vld [vmem:[#allocation2] sm:$0xff]  ;;  %v95_v15 = vpop.permute.xlu1 %94 }
  0x85   :  { %v49_v14 = vld [vmem:[#allocation2 + $0x8] sm:$0xff]  ;;  %93 = vst.msk [vmem:[#allocation2] sm:$0xf] %vm29_vm5, %v91_v12 }
  0x86   :  { %78 = vmatpush.msra.mxu0 %v49_v14  ;;  %98 = vst.msk [vmem:[#allocation2 + $0x8] sm:$0xf] %vm36_vm4, %v142_v1  ;;  %v109_v17 = vld [vmem:[#allocation2 + $0x10] sm:$0xf] }
  0x87   :  { %102 = vst.msk [vmem:[#allocation2 + $0xc] sm:$0xf] %vm41_vm8, %v100_v11  ;;  %143 = vmatpush.msk.msra.mxu1 %vm60_vm9, %v109_v17 }
  0x88   :  { %79 = vmatpush.msra.mxu0 %v48_v13  ;;  %97 = vst.msk [vmem:[#allocation2 + $0x4] sm:$0xf] %vm34_vm7, %v95_v15 }
  0x89   :  { %141 = vmatmul.msk.f32.vlgmr.msra.gmra.mxu0 %vm56_vm10, %v14_v16 }
  0x8e   :  { %v108_v18 = vld [vmem:[#allocation2 + $0x8] sm:$0xff] }
  0x8f   :  { %127 = vmatpush.msra.mxu1 %v108_v18  ;;  %v107_v19 = vld [vmem:[#allocation2] sm:$0xff] }
  0x91   :  { %128 = vmatpush.msra.mxu1 %v107_v19 }
  0x92   :  { %144 = vmatmul.msk.f32.vlgmr.msra.gmra.mxu1 %vm56_vm10, %v14_v16 }
 0x106   :  { %v81_v21 = vpop.f32.mrf.mxu0 }
 0x107   :  { %v82_v22 = vadd.f32 %v81_v21, %v54_v20 }
 0x109   :  { %v84_v23 = vmax.f32 %v82_v22, 0.0 }
 0x10b   :  { %86 = vst.msk [vmem:[%s213_s3] sm:$0x3f] %vm85_vm11, %v84_v23 }
 0x10f   :  { %v130_v24 = vpop.f32.mrf.mxu1 }
 0x110   :  { %v131_v25 = vadd.f32 %v130_v24, %v54_v20 }
 0x112   :  { %v133_v26 = vmax.f32 %v131_v25, 0.0 }
 0x114   :  { %145 = vst.msk [vmem:[%s213_s3 + $0x8] sm:$0x3f] %vm85_vm11, %v133_v26 }

</bundles_post_ra>
